<compile_context>
chip_gen: v7x
topology: tpu7x:2x2x1
jax: 0.10.0
libtpu: 0.0.40
codegen_flags: <defaults>
</compile_context>

<pallas_src>
import math

import jax
import jax.numpy as jnp
from jax.experimental import pallas as pl
from jax.experimental.pallas import tpu as pltpu

HIDDEN = 150          # logical hidden width (as in the PyTorch module)
HIDDEN_PAD = 256      # lane-padded hidden width (zero-padded weights)
OUT_ROWS = 8          # sublane-padded output rows (row 0 is the real output)
K_TILE_MAX = 2048     # max input-feature tile (bounds resident VMEM on v7x)


def _round_up(n, m):
    return (n + m - 1) // m * m


def _k_tiling(input_dim):
    """(tile_k, k_pad, num_k) for the input-feature reduction axis."""
    k_min = _round_up(input_dim, 128)
    tile_k = k_min if k_min <= K_TILE_MAX else K_TILE_MAX
    k_pad = _round_up(input_dim, tile_k)
    return tile_k, k_pad, k_pad // tile_k


def _default_act_dtype():
    """bf16 activations on chips with bf16 VPU/EUP (v6e/v7x), else f32."""
    try:
        kind = jax.devices()[0].device_kind.lower()
    except Exception:
        return jnp.float32
    return jnp.bfloat16 if ("v6" in kind or "v7" in kind) else jnp.float32


def _make_kernel(act_dtype):
    def sigmoid(z):
        # 0.5*tanh(0.5*z)+0.5: one EUP push per element (vs exp + reciprocal);
        # the mul/add ride the VALU which has slack here.
        z = z.astype(act_dtype)
        return jnp.tanh(z * 0.5) * 0.5 + 0.5

    def linear(h, w_ref, b_ref):
        # bf16 MXU inputs, f32 accumulation; the astype is a no-op when the
        # activation chain already runs in bf16.
        return jnp.dot(h.astype(jnp.bfloat16), w_ref[...],
                       preferred_element_type=jnp.float32) + b_ref[...]

    def kernel(x_ref, w1_ref, b1_ref, w2_ref, b2_ref, w3_ref, b3_ref,
               w4t_ref, b4t_ref, o_ref, acc_ref):
        k = pl.program_id(1)

        @pl.when(k == 0)
        def _():
            acc_ref[...] = jnp.zeros_like(acc_ref)

        # Layer-1 partial product for this K slice (f32 accumulator).
        x = x_ref[...].astype(jnp.bfloat16)
        acc_ref[...] += jnp.dot(x, w1_ref[...],
                                preferred_element_type=jnp.float32)

        @pl.when(k == pl.num_programs(1) - 1)
        def _():
            h = sigmoid(acc_ref[...] + b1_ref[...])
            h = sigmoid(linear(h, w2_ref, b2_ref))
            h = sigmoid(linear(h, w3_ref, b3_ref))
            # Final layer transposed so the store is a lane-dense
            # (OUT_ROWS, tile_b) slab: out[o, b] = sum_k w4t[o, k] * h[b, k].
            logits = jax.lax.dot_general(
                w4t_ref[...], h.astype(jnp.bfloat16),
                dimension_numbers=(((1,), (1,)), ((), ())),
                preferred_element_type=jnp.float32) + b4t_ref[...]
            o_ref[...] = sigmoid(logits)[None].astype(o_ref.dtype)

    return kernel


def _const_spec(shape):
    """BlockSpec for a weight/bias that is resident across all grid steps.

    Single-buffered (pl.Buffered(1)) so big resident weights are not
    pointlessly double-buffered; falls back to the default if unsupported."""
    idx = lambda i, k: (0,) * len(shape)
    if hasattr(pl, "Buffered"):
        try:
            return pl.BlockSpec(shape, idx, pipeline_mode=pl.Buffered(1))
        except TypeError:
            pass
    return pl.BlockSpec(shape, idx)


def aush_discriminator(x, padded_params, *, tile_b=None, act_dtype=None):
    """x: (batch, input_dim) float32/bf16. padded_params: output of pad_params()."""
    batch, input_dim = x.shape
    if act_dtype is None:
        act_dtype = _default_act_dtype()

    tile_k, k_pad, num_k = _k_tiling(input_dim)
    w1 = padded_params["w1"]
    assert w1.shape[0] == k_pad, "padded_params built for a different input_dim"

    # Batch tile: MXU-filling, but >= 2 tiles for mid-sized batches so v7x's
    # two TensorCores both get work; small batches round to 16 (bf16 sublane
    # packing).
    if tile_b is None:
        if batch >= 1024:
            tile_b = 512
        elif batch >= 256:
            tile_b = 256
        else:
            tile_b = _round_up(max(batch, 16), 16)
        if tile_b >= 256 and _round_up(batch, tile_b) // tile_b == 1:
            tile_b //= 2
    b_pad = _round_up(batch, tile_b)
    num_b = b_pad // tile_b
    grid = (num_b, num_k)

    # Avoid the wrapper-side pad+cast copy when x is already tile-aligned;
    # the kernel casts to bf16 at the dot input either way.
    if b_pad == batch and k_pad == input_dim:
        x_in = x
    else:
        x_in = jnp.pad(x.astype(jnp.bfloat16),
                       ((0, b_pad - batch), (0, k_pad - input_dim)))

    names = ("w1", "b1", "w2", "b2", "w3", "b3", "w4", "b4")
    weights = [padded_params[n] for n in names]

    in_specs = [
        pl.BlockSpec((tile_b, tile_k), lambda i, k: (i, k)),          # x
        # w1 is the only weight whose block changes along K: keep it
        # double-buffered when the K axis is real, single-buffered otherwise.
        (pl.BlockSpec((tile_k, HIDDEN_PAD), lambda i, k: (k, 0))
         if num_k > 1 else _const_spec((tile_k, HIDDEN_PAD))),        # w1
        _const_spec((1, HIDDEN_PAD)),                                 # b1
        _const_spec((HIDDEN_PAD, HIDDEN_PAD)),                        # w2
        _const_spec((1, HIDDEN_PAD)),                                 # b2
        _const_spec((HIDDEN_PAD, HIDDEN_PAD)),                        # w3
        _const_spec((1, HIDDEN_PAD)),                                 # b3
        _const_spec((OUT_ROWS, HIDDEN_PAD)),                          # w4 (out,in)
        _const_spec((OUT_ROWS, 1)),                                   # b4 (out,1)
    ]
    out_specs = pl.BlockSpec((1, OUT_ROWS, tile_b), lambda i, k: (i, 0, 0))

    # VMEM budget: resident weights + pipelined x/w1/out tiles + accumulator
    # + activation temporaries + headroom; cap is generation-aware.
    resident = sum(int(padded_params[n].size) * padded_params[n].dtype.itemsize
                   for n in ("b1", "w2", "b2", "w3", "b3", "w4", "b4"))
    w1_tile = tile_k * HIDDEN_PAD * 2 * (2 if num_k > 1 else 1)
    x_tile = tile_b * tile_k * x_in.dtype.itemsize * 2
    out_tile = OUT_ROWS * tile_b * 4 * 2
    acc_bytes = tile_b * HIDDEN_PAD * 4
    act_bytes = 4 * tile_b * HIDDEN_PAD * 4
    budget = (resident + w1_tile + x_tile + out_tile
              + acc_bytes + act_bytes + (8 << 20))
    try:
        vmem_cap = int(pltpu.get_tpu_info().vmem_capacity_bytes)
    except Exception:
        vmem_cap = 64 << 20
    vmem_limit = int(min(max(budget, 32 << 20), vmem_cap - (8 << 20)))

    out = pl.pallas_call(
        _make_kernel(act_dtype),
        out_shape=jax.ShapeDtypeStruct((num_b, OUT_ROWS, tile_b), jnp.float32),
        grid=grid,
        in_specs=in_specs,
        out_specs=out_specs,
        scratch_shapes=[pltpu.VMEM((tile_b, HIDDEN_PAD), jnp.float32)],
        compiler_params=pltpu.CompilerParams(
            dimension_semantics=("parallel", "arbitrary"),
            vmem_limit_bytes=vmem_limit,
        ),
    )(x_in, *weights)

    # Sublane row 0 of each (OUT_ROWS, tile_b) slab is the real scalar output.
    return out[:, 0, :].reshape(b_pad)[:batch].reshape(batch, 1)


def init_params(key, input_dim):
    """PyTorch nn.Linear default init: U(-1/sqrt(fan_in), 1/sqrt(fan_in)).

    Logical (unpadded) parameters, weights stored (in, out)."""
    dims = [(input_dim, HIDDEN), (HIDDEN, HIDDEN), (HIDDEN, HIDDEN), (HIDDEN, 1)]
    params = {}
    for i, (fan_in, fan_out) in enumerate(dims, start=1):
        key, kw, kb = jax.random.split(key, 3)
        bound = 1.0 / math.sqrt(fan_in)
        params[f"w{i}"] = jax.random.uniform(
            kw, (fan_in, fan_out), jnp.float32, -bound, bound)
        params[f"b{i}"] = jax.random.uniform(
            kb, (1, fan_out), jnp.float32, -bound, bound)
    return params


def pad_params(params, input_dim):
    """Zero-pad to MXU/lane shapes; weights -> bf16, biases stay f32.

    w4/b4 are stored transposed (out, in) / (out, 1) for the lane-dense
    final-layer store.  Padding is exact (see header comment)."""
    _, k_pad, _ = _k_tiling(input_dim)

    def padw(w, rows, cols):
        return jnp.pad(w, ((0, rows - w.shape[0]),
                           (0, cols - w.shape[1]))).astype(jnp.bfloat16)

    def padb(b, rows, cols):
        return jnp.pad(b, ((0, rows - b.shape[0]),
                           (0, cols - b.shape[1]))).astype(jnp.float32)

    return {
        "w1": padw(params["w1"], k_pad, HIDDEN_PAD),
        "b1": padb(params["b1"], 1, HIDDEN_PAD),
        "w2": padw(params["w2"], HIDDEN_PAD, HIDDEN_PAD),
        "b2": padb(params["b2"], 1, HIDDEN_PAD),
        "w3": padw(params["w3"], HIDDEN_PAD, HIDDEN_PAD),
        "b3": padb(params["b3"], 1, HIDDEN_PAD),
        "w4": padw(params["w4"].T, OUT_ROWS, HIDDEN_PAD),
        "b4": padb(params["b4"].T, OUT_ROWS, 1),
    }


def reference_forward(x, params):
    """Pure-JAX f32 reference of the PyTorch module."""
    h = jax.nn.sigmoid(x @ params["w1"] + params["b1"])
    h = jax.nn.sigmoid(h @ params["w2"] + params["b2"])
    h = jax.nn.sigmoid(h @ params["w3"] + params["b3"])
    return jax.nn.sigmoid(h @ params["w4"] + params["b4"])


if __name__ == "__main__":
    key = jax.random.PRNGKey(0)
    batch, input_dim = 8, 32

    key, kx, kp = jax.random.split(key, 3)
    x = jax.random.normal(kx, (batch, input_dim), jnp.float32)
    params = init_params(kp, input_dim)
    pparams = pad_params(params, input_dim)

    out = jax.block_until_ready(aush_discriminator(x, pparams))
    ref = jax.block_until_ready(reference_forward(x, params))

    assert out.shape == (batch, 1)
    # bf16 MXU inputs (+ bf16 tanh-form sigmoid chain on v6e/v7x) vs f32 ref.
    assert jnp.allclose(out, ref, atol=2e-2, rtol=2e-2), "mismatch vs reference"

    print("KERNEL_OK")
</pallas_src>

<mosaic_0001>
module attributes {stable_mosaic.version = 11 : i64} {
  func.func @kernel(%arg0: i32, %arg1: i32, %arg2: memref<16x128xbf16, #tpu.memory_space<vmem>>, %arg3: memref<128x256xbf16, #tpu.memory_space<vmem>>, %arg4: memref<1x256xf32, #tpu.memory_space<vmem>>, %arg5: memref<256x256xbf16, #tpu.memory_space<vmem>>, %arg6: memref<1x256xf32, #tpu.memory_space<vmem>>, %arg7: memref<256x256xbf16, #tpu.memory_space<vmem>>, %arg8: memref<1x256xf32, #tpu.memory_space<vmem>>, %arg9: memref<8x256xbf16, #tpu.memory_space<vmem>>, %arg10: memref<8x1xf32, #tpu.memory_space<vmem>>, %arg11: memref<1x8x16xf32, #tpu.memory_space<vmem>>, %arg12: memref<16x256xf32, #tpu.memory_space<vmem>>) attributes {dimension_semantics = [#tpu.dimension_semantics<parallel>, #tpu.dimension_semantics<arbitrary>], iteration_bounds = array<i64: 1, 1>, scalar_prefetch = 0 : i64, scratch_operands = 1 : i64, tpu.core_type = #tpu.core_type<tc>, window_params = [{transform_indices = @transform_0, window_bounds = array<i64: 16, 128>}, {pipeline_mode = #tpu.pipeline_mode<synchronous>, transform_indices = @transform_1, window_bounds = array<i64: 128, 256>}, {pipeline_mode = #tpu.pipeline_mode<synchronous>, transform_indices = @transform_2, window_bounds = array<i64: 1, 256>}, {pipeline_mode = #tpu.pipeline_mode<synchronous>, transform_indices = @transform_3, window_bounds = array<i64: 256, 256>}, {pipeline_mode = #tpu.pipeline_mode<synchronous>, transform_indices = @transform_4, window_bounds = array<i64: 1, 256>}, {pipeline_mode = #tpu.pipeline_mode<synchronous>, transform_indices = @transform_5, window_bounds = array<i64: 256, 256>}, {pipeline_mode = #tpu.pipeline_mode<synchronous>, transform_indices = @transform_6, window_bounds = array<i64: 1, 256>}, {pipeline_mode = #tpu.pipeline_mode<synchronous>, transform_indices = @transform_7, window_bounds = array<i64: 8, 256>}, {pipeline_mode = #tpu.pipeline_mode<synchronous>, transform_indices = @transform_8, window_bounds = array<i64: 8, 1>}, {transform_indices = @transform_9, window_bounds = array<i64: 1, 8, 16>}]} {
    %c0_i32 = arith.constant 0 : i32
    %0 = arith.cmpi eq, %arg1, %c0_i32 : i32
    %1 = arith.extui %0 : i1 to i32
    %c0_i32_0 = arith.constant 0 : i32
    %2 = arith.cmpi ne, %1, %c0_i32_0 : i32
    scf.if %2 {
      %cst_10 = arith.constant 0.000000e+00 : f32
      %12 = vector.broadcast %cst_10 : f32 to vector<16x256xf32>
      %c0_11 = arith.constant 0 : index
      %c0_12 = arith.constant 0 : index
      %13 = vector.load %arg12[%c0_11, %c0_12] : memref<16x256xf32, #tpu.memory_space<vmem>>, vector<16x256xf32>
      tpu.vector_store %arg12[%c0_11, %c0_12], %12 {strides = array<i32>} : memref<16x256xf32, #tpu.memory_space<vmem>>, vector<16x256xf32>,
    } else {
    }
    %c0 = arith.constant 0 : index
    %c0_1 = arith.constant 0 : index
    %3 = vector.load %arg2[%c0, %c0_1] : memref<16x128xbf16, #tpu.memory_space<vmem>>, vector<16x128xbf16>
    %c0_2 = arith.constant 0 : index
    %c0_3 = arith.constant 0 : index
    %4 = vector.load %arg12[%c0_2, %c0_3] : memref<16x256xf32, #tpu.memory_space<vmem>>, vector<16x256xf32>
    %c0_4 = arith.constant 0 : index
    %c0_5 = arith.constant 0 : index
    %5 = vector.load %arg3[%c0_4, %c0_5] : memref<128x256xbf16, #tpu.memory_space<vmem>>, vector<128x256xbf16>
    %cst = arith.constant dense<0.000000e+00> : vector<16x256xf32>
    %6 = tpu.matmul %3, %5, %cst {dimension_numbers = #tpu.dot_dimension_numbers<[1], [0], [0], [1], [0, 0, 1, 1], [], []>} : vector<16x128xbf16>, vector<128x256xbf16>, vector<16x256xf32> -> vector<16x256xf32>
    %7 = arith.addf %4, %6 : vector<16x256xf32>
    %c0_6 = arith.constant 0 : index
    %c0_7 = arith.constant 0 : index
    %8 = vector.load %arg12[%c0_6, %c0_7] : memref<16x256xf32, #tpu.memory_space<vmem>>, vector<16x256xf32>
    tpu.vector_store %arg12[%c0_6, %c0_7], %7 {strides = array<i32>} : memref<16x256xf32, #tpu.memory_space<vmem>>, vector<16x256xf32>,
    %c0_i32_8 = arith.constant 0 : i32
    %9 = arith.cmpi eq, %arg1, %c0_i32_8 : i32
    %10 = arith.extui %9 : i1 to i32
    %c0_i32_9 = arith.constant 0 : i32
    %11 = arith.cmpi ne, %10, %c0_i32_9 : i32
    scf.if %11 {
      %c0_10 = arith.constant 0 : index
      %c0_11 = arith.constant 0 : index
      %12 = vector.load %arg12[%c0_10, %c0_11] : memref<16x256xf32, #tpu.memory_space<vmem>>, vector<16x256xf32>
      %c0_12 = arith.constant 0 : index
      %c0_13 = arith.constant 0 : index
      %13 = vector.load %arg4[%c0_12, %c0_13] : memref<1x256xf32, #tpu.memory_space<vmem>>, vector<1x256xf32>
      %14 = vector.broadcast %13 : vector<1x256xf32> to vector<16x256xf32>
      %15 = arith.addf %12, %14 : vector<16x256xf32>
      %cst_14 = arith.constant 5.000000e-01 : f32
      %16 = vector.broadcast %cst_14 : f32 to vector<16x256xf32>
      %17 = arith.mulf %15, %16 : vector<16x256xf32>
      %18 = math.tanh %17 : vector<16x256xf32>
      %cst_15 = arith.constant 5.000000e-01 : f32
      %19 = vector.broadcast %cst_15 : f32 to vector<16x256xf32>
      %20 = arith.mulf %18, %19 : vector<16x256xf32>
      %cst_16 = arith.constant 5.000000e-01 : f32
      %21 = vector.broadcast %cst_16 : f32 to vector<16x256xf32>
      %22 = arith.addf %20, %21 : vector<16x256xf32>
      %23 = arith.truncf %22 : vector<16x256xf32> to vector<16x256xbf16>
      %c0_17 = arith.constant 0 : index
      %c0_18 = arith.constant 0 : index
      %24 = vector.load %arg5[%c0_17, %c0_18] : memref<256x256xbf16, #tpu.memory_space<vmem>>, vector<256x256xbf16>
      %cst_19 = arith.constant dense<0.000000e+00> : vector<16x256xf32>
      %25 = tpu.matmul %23, %24, %cst_19 {dimension_numbers = #tpu.dot_dimension_numbers<[1], [0], [0], [1], [0, 0, 1, 1], [], []>} : vector<16x256xbf16>, vector<256x256xbf16>, vector<16x256xf32> -> vector<16x256xf32>
      %c0_20 = arith.constant 0 : index
      %c0_21 = arith.constant 0 : index
      %26 = vector.load %arg6[%c0_20, %c0_21] : memref<1x256xf32, #tpu.memory_space<vmem>>, vector<1x256xf32>
      %27 = vector.broadcast %26 : vector<1x256xf32> to vector<16x256xf32>
      %28 = arith.addf %25, %27 : vector<16x256xf32>
      %cst_22 = arith.constant 5.000000e-01 : f32
      %29 = vector.broadcast %cst_22 : f32 to vector<16x256xf32>
      %30 = arith.mulf %28, %29 : vector<16x256xf32>
      %31 = math.tanh %30 : vector<16x256xf32>
      %cst_23 = arith.constant 5.000000e-01 : f32
      %32 = vector.broadcast %cst_23 : f32 to vector<16x256xf32>
      %33 = arith.mulf %31, %32 : vector<16x256xf32>
      %cst_24 = arith.constant 5.000000e-01 : f32
      %34 = vector.broadcast %cst_24 : f32 to vector<16x256xf32>
      %35 = arith.addf %33, %34 : vector<16x256xf32>
      %36 = arith.truncf %35 : vector<16x256xf32> to vector<16x256xbf16>
      %c0_25 = arith.constant 0 : index
      %c0_26 = arith.constant 0 : index
      %37 = vector.load %arg7[%c0_25, %c0_26] : memref<256x256xbf16, #tpu.memory_space<vmem>>, vector<256x256xbf16>
      %cst_27 = arith.constant dense<0.000000e+00> : vector<16x256xf32>
      %38 = tpu.matmul %36, %37, %cst_27 {dimension_numbers = #tpu.dot_dimension_numbers<[1], [0], [0], [1], [0, 0, 1, 1], [], []>} : vector<16x256xbf16>, vector<256x256xbf16>, vector<16x256xf32> -> vector<16x256xf32>
      %c0_28 = arith.constant 0 : index
      %c0_29 = arith.constant 0 : index
      %39 = vector.load %arg8[%c0_28, %c0_29] : memref<1x256xf32, #tpu.memory_space<vmem>>, vector<1x256xf32>
      %40 = vector.broadcast %39 : vector<1x256xf32> to vector<16x256xf32>
      %41 = arith.addf %38, %40 : vector<16x256xf32>
      %cst_30 = arith.constant 5.000000e-01 : f32
      %42 = vector.broadcast %cst_30 : f32 to vector<16x256xf32>
      %43 = arith.mulf %41, %42 : vector<16x256xf32>
      %44 = math.tanh %43 : vector<16x256xf32>
      %cst_31 = arith.constant 5.000000e-01 : f32
      %45 = vector.broadcast %cst_31 : f32 to vector<16x256xf32>
      %46 = arith.mulf %44, %45 : vector<16x256xf32>
      %cst_32 = arith.constant 5.000000e-01 : f32
      %47 = vector.broadcast %cst_32 : f32 to vector<16x256xf32>
      %48 = arith.addf %46, %47 : vector<16x256xf32>
      %c0_33 = arith.constant 0 : index
      %c0_34 = arith.constant 0 : index
      %49 = vector.load %arg9[%c0_33, %c0_34] : memref<8x256xbf16, #tpu.memory_space<vmem>>, vector<8x256xbf16>
      %50 = arith.truncf %48 : vector<16x256xf32> to vector<16x256xbf16>
      %cst_35 = arith.constant dense<0.000000e+00> : vector<8x16xf32>
      %51 = tpu.matmul %49, %50, %cst_35 {dimension_numbers = #tpu.dot_dimension_numbers<[1], [1], [0], [0], [0, 0, 1, 0], [], []>} : vector<8x256xbf16>, vector<16x256xbf16>, vector<8x16xf32> -> vector<8x16xf32>
      %c0_36 = arith.constant 0 : index
      %c0_37 = arith.constant 0 : index
      %52 = vector.load %arg10[%c0_36, %c0_37] : memref<8x1xf32, #tpu.memory_space<vmem>>, vector<8x1xf32>
      %53 = vector.broadcast %52 : vector<8x1xf32> to vector<8x16xf32>
      %54 = arith.addf %51, %53 : vector<8x16xf32>
      %cst_38 = arith.constant 5.000000e-01 : f32
      %55 = vector.broadcast %cst_38 : f32 to vector<8x16xf32>
      %56 = arith.mulf %54, %55 : vector<8x16xf32>
      %57 = math.tanh %56 : vector<8x16xf32>
      %cst_39 = arith.constant 5.000000e-01 : f32
      %58 = vector.broadcast %cst_39 : f32 to vector<8x16xf32>
      %59 = arith.mulf %57, %58 : vector<8x16xf32>
      %cst_40 = arith.constant 5.000000e-01 : f32
      %60 = vector.broadcast %cst_40 : f32 to vector<8x16xf32>
      %61 = arith.addf %59, %60 : vector<8x16xf32>
      %62 = vector.shape_cast %61 : vector<8x16xf32> to vector<1x8x16xf32>
      %c0_41 = arith.constant 0 : index
      %c0_42 = arith.constant 0 : index
      %c0_43 = arith.constant 0 : index
      %63 = vector.load %arg11[%c0_41, %c0_42, %c0_43] : memref<1x8x16xf32, #tpu.memory_space<vmem>>, vector<1x8x16xf32>
      tpu.vector_store %arg11[%c0_41, %c0_42, %c0_43], %62 {strides = array<i32>} : memref<1x8x16xf32, #tpu.memory_space<vmem>>, vector<1x8x16xf32>,
    } else {
    }
    return
  }
  func.func @transform_0(%arg0: i32, %arg1: i32) -> (i32, i32) {
    %c0_i32 = arith.constant 0 : i32
    return %arg0, %arg1 : i32, i32
  }
  func.func @transform_1(%arg0: i32, %arg1: i32) -> (i32, i32) {
    %c0_i32 = arith.constant 0 : i32
    %c0_i32_0 = arith.constant 0 : i32
    %c0_i32_1 = arith.constant 0 : i32
    return %c0_i32, %c0_i32_0 : i32, i32
  }
  func.func @transform_2(%arg0: i32, %arg1: i32) -> (i32, i32) {
    %c0_i32 = arith.constant 0 : i32
    %c0_i32_0 = arith.constant 0 : i32
    %c0_i32_1 = arith.constant 0 : i32
    return %c0_i32, %c0_i32_0 : i32, i32
  }
  func.func @transform_3(%arg0: i32, %arg1: i32) -> (i32, i32) {
    %c0_i32 = arith.constant 0 : i32
    %c0_i32_0 = arith.constant 0 : i32
    %c0_i32_1 = arith.constant 0 : i32
    return %c0_i32, %c0_i32_0 : i32, i32
  }
  func.func @transform_4(%arg0: i32, %arg1: i32) -> (i32, i32) {
    %c0_i32 = arith.constant 0 : i32
    %c0_i32_0 = arith.constant 0 : i32
    %c0_i32_1 = arith.constant 0 : i32
    return %c0_i32, %c0_i32_0 : i32, i32
  }
  func.func @transform_5(%arg0: i32, %arg1: i32) -> (i32, i32) {
    %c0_i32 = arith.constant 0 : i32
    %c0_i32_0 = arith.constant 0 : i32
    %c0_i32_1 = arith.constant 0 : i32
    return %c0_i32, %c0_i32_0 : i32, i32
  }
  func.func @transform_6(%arg0: i32, %arg1: i32) -> (i32, i32) {
    %c0_i32 = arith.constant 0 : i32
    %c0_i32_0 = arith.constant 0 : i32
    %c0_i32_1 = arith.constant 0 : i32
    return %c0_i32, %c0_i32_0 : i32, i32
  }
  func.func @transform_7(%arg0: i32, %arg1: i32) -> (i32, i32) {
    %c0_i32 = arith.constant 0 : i32
    %c0_i32_0 = arith.constant 0 : i32
    %c0_i32_1 = arith.constant 0 : i32
    return %c0_i32, %c0_i32_0 : i32, i32
  }
  func.func @transform_8(%arg0: i32, %arg1: i32) -> (i32, i32) {
    %c0_i32 = arith.constant 0 : i32
    %c0_i32_0 = arith.constant 0 : i32
    %c0_i32_1 = arith.constant 0 : i32
    return %c0_i32, %c0_i32_0 : i32, i32
  }
  func.func @transform_9(%arg0: i32, %arg1: i32) -> (i32, i32, i32) {
    %c0_i32 = arith.constant 0 : i32
    %c0_i32_0 = arith.constant 0 : i32
    %c0_i32_1 = arith.constant 0 : i32
    return %arg0, %c0_i32, %c0_i32_0 : i32, i32, i32
  }
}

</mosaic_0001>

<bundles_post_ra>
// kernel: tpu_custom_call.1
= control target key start
LH: loop header
LB: loop body
LE: loop exit
PB: predicated region body
PF: predicated region fallthrough
CT: control target
= control target key end

     0   :  { %14 = vsyncpa [#allocation4], 0  ;;  %s1427_s0 = inlined_call_operand.vmem [shape: bf16[16,128], index: 0, kind: input, shape index: {}]   ;;  %s1428_s1 = inlined_call_operand.hbm [shape: bf16[128,256], index: 1, kind: input, shape index: {}]   ;;  %s1429_s2 = inlined_call_operand.hbm [shape: f32[1,256], index: 2, kind: input, shape index: {}]   ;;  %s1430_s3 = inlined_call_operand.hbm [shape: bf16[256,256], index: 3, kind: input, shape index: {}]   ;;  %s1431_s4 = inlined_call_operand.vmem [shape: f32[1,256], index: 4, kind: input, shape index: {}]   ;;  %s1432_s5 = inlined_call_operand.hbm [shape: bf16[256,256], index: 5, kind: input, shape index: {}]   ;;  %s1433_s6 = inlined_call_operand.vmem [shape: f32[1,256], index: 6, kind: input, shape index: {}]   ;;  %s1434_s7 = inlined_call_operand.vmem [shape: bf16[8,256], index: 7, kind: input, shape index: {}]   ;;  %s1435_s8 = inlined_call_operand.vmem [shape: f32[8,1], index: 8, kind: input, shape index: {}]   ;;  %s1436_s9 = inlined_call_operand.hbm [shape: f32[1,8,16], index: 9, kind: output, shape index: {}]  }
   0x1   :  { %15 = vsyncpa [#allocation7], 0 }
   0x2   :  { %16 = vsyncpa [#allocation10], 0 }
   0x3   :  { %17 = vsyncpa [#allocation5], 0  ;;  %s1261_s30 = smov [#allocation6]   ;;  %s1262_s11 = smov [#allocation3]  }
   0x4   :  { %s38_s10 = sshll.u32 %s1261_s30, 4  ;;  %s25_s12 = sshll.u32 %s1262_s11, 4  ;;  %s39_s10 = int_to_ptr.vmem [resolvable:$true] %s38_s10  ;;  %s1319_s12 = int_to_ptr.vmem [resolvable:$true] %s25_s12 }
   0x5   :  { %s1143_s15 = scalar_lea.hbm %s1429_s2, 32 }
   0x6   :  { %p1144_p0 = scmp.ne.s32.totalorder %s1429_s2, %s1143_s15  ;;  %p1147_p1 = scmp.lt.u32.totalorder %s1143_s15, %s1429_s2 }
   0x8   :  { %p1149_p2 = pnand %p1147_p1, %p1144_p0 }
   0xa   :  { %1152 = shalt.err (!%p1149_p2)
}
   0xb   :  { %s1153_s20 = scalar_lea.vmem %s39_s10, 32  ;;  %p1158_p4 = scmp.lt.s32.totalorder %s39_s10, %s39_s10 }
   0xc   :  { %p1154_p3 = scmp.ne.s32.totalorder %s39_s10, %s1153_s20  ;;  %p1159_p5 = scmp.lt.s32.totalorder %s1153_s20, %s1153_s20 }
   0xe   :  { %p1160_p6 = por %p1159_p5, %p1158_p4 }
  0x10   :  { %p1161_p7 = pnand %p1160_p6, %p1154_p3 }
  0x12   :  { %1164 = shalt.err (!%p1161_p7)
}
  0x13   :  { %41 = dma.hbm_to_vmem [thread:$0]  %s1429_s2, 32, %s39_s10, [#allocation7]  }
  0x14   :  { %s1165_s25 = scalar_lea.hbm %s1428_s1, 2048 }
  0x15   :  { %p1166_p8 = scmp.ne.s32.totalorder %s1428_s1, %s1165_s25  ;;  %p1169_p9 = scmp.lt.u32.totalorder %s1165_s25, %s1428_s1 }
  0x17   :  { %p1171_p10 = pnand %p1169_p9, %p1166_p8 }
  0x19   :  { %1174 = shalt.err (!%p1171_p10)
}
  0x1a   :  { %s1175_s30 = scalar_lea.vmem %s1319_s12, 2048  ;;  %p1180_p12 = scmp.lt.s32.totalorder %s1319_s12, %s1319_s12 }
  0x1b   :  { %p1176_p11 = scmp.ne.s32.totalorder %s1319_s12, %s1175_s30  ;;  %p1181_p13 = scmp.lt.s32.totalorder %s1175_s30, %s1175_s30 }
  0x1d   :  { %p1182_p0 = por %p1181_p13, %p1180_p12 }
  0x1f   :  { %p1183_p1 = pnand %p1182_p0, %p1176_p11 }
  0x21   :  { %1186 = shalt.err (!%p1183_p1)
}
  0x22   :  { %s1263_s2 = smov 128   ;;  %s1264_s10 = smov 8  }
  0x23   :  { %31 = dma.hbm_to_vmem [thread:$0]  %s1428_s1, 2048, %s1319_s12, [#allocation4], %s1263_s2, %s1263_s2, %s1264_s10  }
  0x24   :  { %s1265_s14 = smov [#allocation8]   ;;  %s1266_s16 = smov [#allocation9]  }
  0x25   :  { %s47_s15 = sshll.u32 %s1265_s14, 4  ;;  %s61_s17 = sshll.u32 %s1266_s16, 4  ;;  %s48_s15 = int_to_ptr.vmem [resolvable:$true] %s47_s15  ;;  %s1353_s17 = int_to_ptr.vmem [resolvable:$true] %s61_s17 }
  0x26   :  { %s1187_s20 = scalar_lea.hbm %s1430_s3, 4096 }
  0x27   :  { %p1188_p2 = scmp.ne.s32.totalorder %s1430_s3, %s1187_s20  ;;  %p1191_p3 = scmp.lt.u32.totalorder %s1187_s20, %s1430_s3 }
  0x29   :  { %p1193_p4 = pnand %p1191_p3, %p1188_p2 }
  0x2b   :  { %1196 = shalt.err (!%p1193_p4)
}
  0x2c   :  { %s1197_s1 = scalar_lea.vmem %s48_s15, 4096  ;;  %p1202_p6 = scmp.lt.s32.totalorder %s48_s15, %s48_s15 }
  0x2d   :  { %p1198_p5 = scmp.ne.s32.totalorder %s48_s15, %s1197_s1  ;;  %p1203_p7 = scmp.lt.s32.totalorder %s1197_s1, %s1197_s1 }
  0x2f   :  { %p1204_p8 = por %p1203_p7, %p1202_p6 }
  0x31   :  { %p1205_p9 = pnand %p1204_p8, %p1198_p5 }
  0x33   :  { %1208 = shalt.err (!%p1205_p9)
}
  0x34   :  { %53 = dma.hbm_to_vmem [thread:$0]  %s1430_s3, 4096, %s48_s15, [#allocation7], %s1263_s2, %s1263_s2, %s1264_s10  }
  0x35   :  { %s1209_s28 = scalar_lea.hbm %s1432_s5, 4096 }
  0x36   :  { %p1210_p10 = scmp.ne.s32.totalorder %s1432_s5, %s1209_s28  ;;  %p1213_p11 = scmp.lt.u32.totalorder %s1209_s28, %s1432_s5 }
  0x38   :  { %p1215_p12 = pnand %p1213_p11, %p1210_p10 }
  0x3a   :  { %1218 = shalt.err (!%p1215_p12)
}
  0x3b   :  { %s1219_s14 = scalar_lea.vmem %s1353_s17, 4096  ;;  %p1224_p0 = scmp.lt.s32.totalorder %s1353_s17, %s1353_s17 }
  0x3c   :  { %p1220_p13 = scmp.ne.s32.totalorder %s1353_s17, %s1219_s14  ;;  %p1225_p1 = scmp.lt.s32.totalorder %s1219_s14, %s1219_s14 }
  0x3e   :  { %p1226_p2 = por %p1225_p1, %p1224_p0 }
  0x40   :  { %p1227_p3 = pnand %p1226_p2, %p1220_p13 }
  0x42   :  { %1230 = shalt.err (!%p1227_p3)
}
  0x43   :  { %67 = dma.hbm_to_vmem [thread:$0]  %s1432_s5, 4096, %s1353_s17, [#allocation10], %s1263_s2, %s1263_s2, %s1264_s10  }
  0x44   :  { %1253 = dma.done.wait [#allocation4], 2048  }
  0x45   :  { %1254 = vsyncadd [#allocation4], 4294965248 }
  0x46   :  { %1255 = dma.done.wait [#allocation7], 4128  }
  0x47   :  { %1256 = vsyncadd [#allocation7], 4294963168 }
  0x48   :  { %1257 = dma.done.wait [#allocation10], 4096  }
  0x49   :  { %1258 = vsyncadd [#allocation10], 4294963200  ;;  %v1267_v0 = vmov 0   ;;  %v994_v1 = vld [vmem:[#allocation3 + $0x4] ss:$8 sps:$4 sm:$0xff]   ;;  %vm883_vm0 = vcmask 130048  }
  0x4a   :  { %235 = vmatprep.mubr.bf16.mxu0 %v1267_v0  ;;  %993 = vset.pattern.permute.xlu0 %v1267_v0  ;;  %v996_v2 = vld [vmem:[#allocation3] ss:$8 sps:$4 sm:$0xff]   ;;  %v997_v3 = vld [vmem:[#allocation3 + $0x14] ss:$8 sps:$4 sm:$0xff]   ;;  %v999_v4 = vld [vmem:[#allocation3 + $0x10] ss:$8 sps:$4 sm:$0xff]  }
  0x4b   :  { %203 = vmatprep.subr.bf16.mxu0 %v994_v1  ;;  %v1000_v5 = vld [vmem:[#allocation3 + $0x24] ss:$8 sps:$4 sm:$0xff]   ;;  %v1002_v6 = vld [vmem:[#allocation3 + $0x20] ss:$8 sps:$4 sm:$0xff]   ;;  %v1003_v7 = vld [vmem:[#allocation3 + $0x34] ss:$8 sps:$4 sm:$0xff]  }
  0x4c   :  { %204 = vmatpush1.bf16.msra.mxu0 %v996_v2  ;;  %v1005_v8 = vld [vmem:[#allocation3 + $0x30] ss:$8 sps:$4 sm:$0xff]   ;;  %v1006_v9 = vld [vmem:[#allocation3 + $0x44] ss:$8 sps:$4 sm:$0xff]   ;;  %v1008_v13 = vld [vmem:[#allocation3 + $0x40] ss:$8 sps:$4 sm:$0xff]  }
  0x4d   :  { %205 = vmatprep.subr.bf16.mxu0 %v997_v3  ;;  %v1019_v10 = vld [vmem:[#allocation8 + $0x4] ss:$8 sps:$4 sm:$0xff]   ;;  %v1021_v11 = vld [vmem:[#allocation8] ss:$8 sps:$4 sm:$0xff]   ;;  %v1022_v12 = vld [vmem:[#allocation8 + $0x14] ss:$8 sps:$4 sm:$0xff]  }
  0x4e   :  { %499 = vmatprep.subr.bf16.mxu1 %v1019_v10  ;;  %v1024_v14 = vld [vmem:[#allocation8 + $0x10] ss:$8 sps:$4 sm:$0xff]   ;;  %v1025_v16 = vld [vmem:[#allocation8 + $0x24] ss:$8 sps:$4 sm:$0xff]   ;;  %v1027_v18 = vld [vmem:[#allocation8 + $0x20] ss:$8 sps:$4 sm:$0xff]  }
  0x4f   :  { %500 = vmatpush1.bf16.msra.mxu1 %v1021_v11  ;;  %v1009_v15 = vld [vmem:[#allocation3 + $0x54] ss:$8 sps:$4 sm:$0xff]   ;;  %v1011_v17 = vld [vmem:[#allocation3 + $0x50] ss:$8 sps:$4 sm:$0xff]   ;;  %v1012_v19 = vld [vmem:[#allocation3 + $0x64] ss:$8 sps:$4 sm:$0xff]  }
  0x50   :  { %206 = vmatpush1.bf16.msra.mxu0 %v999_v4  ;;  %501 = vmatprep.subr.bf16.mxu1 %v1022_v12  ;;  %v1028_v20 = vld [vmem:[#allocation8 + $0x34] ss:$8 sps:$4 sm:$0xff]   ;;  %v1030_v22 = vld [vmem:[#allocation8 + $0x30] ss:$8 sps:$4 sm:$0xff]   ;;  %v1031_v24 = vld [vmem:[#allocation8 + $0x44] ss:$8 sps:$4 sm:$0xff]  }
  0x51   :  { %207 = vmatprep.subr.bf16.mxu0 %v1000_v5  ;;  %v1014_v21 = vld [vmem:[#allocation3 + $0x60] ss:$8 sps:$4 sm:$0xff]   ;;  %v1015_v23 = vld [vmem:[#allocation3 + $0x74] ss:$8 sps:$4 sm:$0xff]   ;;  %v1017_v25 = vld [vmem:[#allocation3 + $0x70] ss:$8 sps:$4 sm:$0xff]  }
  0x52   :  { %v1033_v26 = vld [vmem:[#allocation8 + $0x40] ss:$8 sps:$4 sm:$0xff]   ;;  %v1034_v27 = vld [vmem:[#allocation8 + $0x54] ss:$8 sps:$4 sm:$0xff]   ;;  %v1036_v29 = vld [vmem:[#allocation8 + $0x50] ss:$8 sps:$4 sm:$0xff]  }
  0x53   :  { %502 = vmatpush1.bf16.msra.mxu1 %v1024_v14  ;;  %v1018_v28 = vld [vmem:[%s1427_s0] sm:$0xff]   ;;  %v1042_v33 = vld [vmem:[#allocation8 + $0x70] ss:$8 sps:$4 sm:$0xff]  }
  0x54   :  { %208 = vmatpush1.bf16.msra.mxu0 %v1002_v6  ;;  %503 = vmatprep.subr.bf16.mxu1 %v1025_v16  ;;  %v1037_v30 = vld [vmem:[#allocation8 + $0x64] ss:$8 sps:$4 sm:$0xff]   ;;  %v1039_v31 = vld [vmem:[#allocation8 + $0x60] ss:$8 sps:$4 sm:$0xff]   ;;  %v1040_v32 = vld [vmem:[#allocation8 + $0x74] ss:$8 sps:$4 sm:$0xff]   ;;  %v263_v6 = vlaneseq }
  0x55   :  { %209 = vmatprep.subr.bf16.mxu0 %v1003_v7  ;;  %v1043_v34 = vld [vmem:[#allocation8 + $0x84] ss:$8 sps:$4 sm:$0xff]   ;;  %v1045_v35 = vld [vmem:[#allocation8 + $0x80] ss:$8 sps:$4 sm:$0xff]   ;;  %v1046_v36 = vld [vmem:[#allocation8 + $0x94] ss:$8 sps:$4 sm:$0xff]  }
  0x56   :  { %v1048_v37 = vld [vmem:[#allocation8 + $0x90] ss:$8 sps:$4 sm:$0xff]   ;;  %v1049_v38 = vld [vmem:[#allocation8 + $0xa4] ss:$8 sps:$4 sm:$0xff]   ;;  %v1051_v39 = vld [vmem:[#allocation8 + $0xa0] ss:$8 sps:$4 sm:$0xff]  }
  0x57   :  { %504 = vmatpush1.bf16.msra.mxu1 %v1027_v18  ;;  %v1052_v40 = vld [vmem:[#allocation8 + $0xb4] ss:$8 sps:$4 sm:$0xff]   ;;  %v1054_v41 = vld [vmem:[#allocation8 + $0xb0] ss:$8 sps:$4 sm:$0xff]   ;;  %v1055_v42 = vld [vmem:[#allocation8 + $0xc4] ss:$8 sps:$4 sm:$0xff]  }
  0x58   :  { %210 = vmatpush1.bf16.msra.mxu0 %v1005_v8  ;;  %505 = vmatprep.subr.bf16.mxu1 %v1028_v20  ;;  %v1057_v43 = vld [vmem:[#allocation8 + $0xc0] ss:$8 sps:$4 sm:$0xff]   ;;  %v1058_v44 = vld [vmem:[#allocation8 + $0xd4] ss:$8 sps:$4 sm:$0xff]   ;;  %v1060_v45 = vld [vmem:[#allocation8 + $0xd0] ss:$8 sps:$4 sm:$0xff]  }
  0x59   :  { %211 = vmatprep.subr.bf16.mxu0 %v1006_v9  ;;  %v1061_v46 = vld [vmem:[#allocation8 + $0xe4] ss:$8 sps:$4 sm:$0xff]   ;;  %v1063_v47 = vld [vmem:[#allocation8 + $0xe0] ss:$8 sps:$4 sm:$0xff]   ;;  %v1064_v48 = vld [vmem:[#allocation8 + $0xf4] ss:$8 sps:$4 sm:$0xff]  }
  0x5a   :  { %v1066_v49 = vld [vmem:[#allocation8 + $0xf0] ss:$8 sps:$4 sm:$0xff]   ;;  %v1067_v50 = vld [vmem:[#allocation9] ss:$8 sps:$4 sm:$0xff]   ;;  %v1069_v51 = vld [vmem:[#allocation9 + $0x4] ss:$8 sps:$4 sm:$0xff]  }
  0x5b   :  { %506 = vmatpush1.bf16.msra.mxu1 %v1030_v22  ;;  %v1072_v52 = vld [vmem:[#allocation9 + $0x14] ss:$8 sps:$4 sm:$0xff]   ;;  %v1070_v53 = vld [vmem:[#allocation9 + $0x10] ss:$8 sps:$4 sm:$0xff]   ;;  %v1075_v54 = vld [vmem:[#allocation9 + $0x24] ss:$8 sps:$4 sm:$0xff]  }
  0x5c   :  { %212 = vmatpush1.bf16.msra.mxu0 %v1008_v13  ;;  %507 = vmatprep.subr.bf16.mxu1 %v1031_v24  ;;  %v1073_v55 = vld [vmem:[#allocation9 + $0x20] ss:$8 sps:$4 sm:$0xff]   ;;  %v1078_v56 = vld [vmem:[#allocation9 + $0x34] ss:$8 sps:$4 sm:$0xff]   ;;  %v1076_v57 = vld [vmem:[#allocation9 + $0x30] ss:$8 sps:$4 sm:$0xff]  }
  0x5d   :  { %213 = vmatprep.subr.bf16.mxu0 %v1009_v15  ;;  %v1081_v58 = vld [vmem:[#allocation9 + $0x44] ss:$8 sps:$4 sm:$0xff]   ;;  %v1079_v59 = vld [vmem:[#allocation9 + $0x40] ss:$8 sps:$4 sm:$0xff]   ;;  %v1084_v60 = vld [vmem:[#allocation9 + $0x54] ss:$8 sps:$4 sm:$0xff]  }
  0x5e   :  { %v1082_v61 = vld [vmem:[#allocation9 + $0x50] ss:$8 sps:$4 sm:$0xff]   ;;  %v1087_v62 = vld [vmem:[#allocation9 + $0x64] ss:$8 sps:$4 sm:$0xff]   ;;  %v1085_v63 = vld [vmem:[#allocation9 + $0x60] ss:$8 sps:$4 sm:$0xff]  }
  0x5f   :  { %508 = vmatpush1.bf16.msra.mxu1 %v1033_v26  ;;  %v1090_v0 = vld [vmem:[#allocation9 + $0x74] ss:$8 sps:$4 sm:$0xff]   ;;  %v1088_v1 = vld [vmem:[#allocation9 + $0x70] ss:$8 sps:$4 sm:$0xff]   ;;  %v1093_v2 = vld [vmem:[#allocation9 + $0x84] ss:$8 sps:$4 sm:$0xff]  }
  0x60   :  { %214 = vmatpush1.bf16.msra.mxu0 %v1011_v17  ;;  %509 = vmatprep.subr.bf16.mxu1 %v1034_v27  ;;  %v1091_v3 = vld [vmem:[#allocation9 + $0x80] ss:$8 sps:$4 sm:$0xff]   ;;  %v1096_v4 = vld [vmem:[#allocation9 + $0x94] ss:$8 sps:$4 sm:$0xff]   ;;  %v1094_v5 = vld [vmem:[#allocation9 + $0x90] ss:$8 sps:$4 sm:$0xff]  }
  0x61   :  { %215 = vmatprep.subr.bf16.mxu0 %v1012_v19  ;;  %v264_v7 = vshrl.u32 %v263_v6, 7  ;;  %v261_v9 = vld [vmem:[#allocation6] sm:$0x3] }
  0x63   :  { %510 = vmatpush1.bf16.msra.mxu1 %v1036_v29  ;;  %v1393_v8 = vsub.s32 0, %v264_v7  ;;  %v1395_v10 = vsub.s32 1, %v264_v7 }
  0x64   :  { %216 = vmatpush1.bf16.msra.mxu0 %v1014_v21  ;;  %511 = vmatprep.subr.bf16.mxu1 %v1037_v30 }
  0x65   :  { %217 = vmatprep.subr.bf16.mxu0 %v1015_v23  ;;  %v266_v11 = vrot.slane %v261_v9, %v1393_v8  ;;  %v270_v12 = vrot.slane %v261_v9, %v1395_v10 }
  0x67   :  { %512 = vmatpush1.bf16.msra.mxu1 %v1039_v31 }
  0x68   :  { %218 = vmatpush1.bf16.msra.mxu0 %v1017_v25  ;;  %513 = vmatprep.subr.bf16.mxu1 %v1040_v32 }
  0x69   :  { %764 = vmatprep.subr.bf16.mxu0 %v1069_v51  ;;  %v327_v51 = vld [vmem:[%s1431_s4] sm:$0x3] }
  0x6b   :  { %236 = vmatmul.mubr.bf16.vlgmr.msra.gmra.mrb[0].mxu0 %v1018_v28  ;;  %514 = vmatpush1.bf16.msra.mxu1 %v1042_v33 }
  0x6c   :  { %515 = vmatprep.subr.bf16.mxu1 %v1043_v34  ;;  %765 = vmatpush1.bf16.msra.mxu0 %v1067_v50  ;;  %v1112_v50 = vld [vmem:[#allocation9 + $0xf0] ss:$8 sps:$4 sm:$0xff]  }
  0x6d   :  { %766 = vmatprep.subr.bf16.mxu0 %v1072_v52  ;;  %v332_v52 = vrot.slane %v327_v51, %v1393_v8 }
  0x6f   :  { %516 = vmatpush1.bf16.msra.mxu1 %v1045_v35 }
  0x70   :  { %517 = vmatprep.subr.bf16.mxu1 %v1046_v36  ;;  %767 = vmatpush1.bf16.msra.mxu0 %v1070_v53  ;;  %v336_v53 = vrot.slane %v327_v51, %v1395_v10 }
  0x71   :  { %768 = vmatprep.subr.bf16.mxu0 %v1075_v54 }
  0x73   :  { %518 = vmatpush1.bf16.msra.mxu1 %v1048_v37 }
  0x74   :  { %519 = vmatprep.subr.bf16.mxu1 %v1049_v38  ;;  %769 = vmatpush1.bf16.msra.mxu0 %v1073_v55 }
  0x75   :  { %770 = vmatprep.subr.bf16.mxu0 %v1078_v56 }
  0x77   :  { %520 = vmatpush1.bf16.msra.mxu1 %v1051_v39  ;;  %v1099_v39 = vld [vmem:[#allocation9 + $0xa4] ss:$8 sps:$4 sm:$0xff]  }
  0x78   :  { %521 = vmatprep.subr.bf16.mxu1 %v1052_v40  ;;  %771 = vmatpush1.bf16.msra.mxu0 %v1076_v57  ;;  %v1097_v40 = vld [vmem:[#allocation9 + $0xa0] ss:$8 sps:$4 sm:$0xff]  }
  0x79   :  { %772 = vmatprep.subr.bf16.mxu0 %v1081_v58 }
  0x7b   :  { %522 = vmatpush1.bf16.msra.mxu1 %v1054_v41  ;;  %v1102_v41 = vld [vmem:[#allocation9 + $0xb4] ss:$8 sps:$4 sm:$0xff]  }
  0x7c   :  { %523 = vmatprep.subr.bf16.mxu1 %v1055_v42  ;;  %773 = vmatpush1.bf16.msra.mxu0 %v1079_v59  ;;  %v1100_v42 = vld [vmem:[#allocation9 + $0xb0] ss:$8 sps:$4 sm:$0xff]  }
  0x7d   :  { %774 = vmatprep.subr.bf16.mxu0 %v1084_v60 }
  0x7f   :  { %524 = vmatpush1.bf16.msra.mxu1 %v1057_v43  ;;  %v1105_v43 = vld [vmem:[#allocation9 + $0xc4] ss:$8 sps:$4 sm:$0xff]  }
  0x80   :  { %525 = vmatprep.subr.bf16.mxu1 %v1058_v44  ;;  %775 = vmatpush1.bf16.msra.mxu0 %v1082_v61  ;;  %v1103_v44 = vld [vmem:[#allocation9 + $0xc0] ss:$8 sps:$4 sm:$0xff]  }
  0x81   :  { %776 = vmatprep.subr.bf16.mxu0 %v1087_v62 }
  0x83   :  { %526 = vmatpush1.bf16.msra.mxu1 %v1060_v45  ;;  %v1108_v45 = vld [vmem:[#allocation9 + $0xd4] ss:$8 sps:$4 sm:$0xff]  }
  0x84   :  { %527 = vmatprep.subr.bf16.mxu1 %v1061_v46  ;;  %777 = vmatpush1.bf16.msra.mxu0 %v1085_v63  ;;  %v1106_v46 = vld [vmem:[#allocation9 + $0xd0] ss:$8 sps:$4 sm:$0xff]  }
  0x85   :  { %778 = vmatprep.subr.bf16.mxu0 %v1090_v0 }
  0x87   :  { %528 = vmatpush1.bf16.msra.mxu1 %v1063_v47  ;;  %v1111_v47 = vld [vmem:[#allocation9 + $0xe4] ss:$8 sps:$4 sm:$0xff]  }
  0x88   :  { %529 = vmatprep.subr.bf16.mxu1 %v1064_v48  ;;  %779 = vmatpush1.bf16.msra.mxu0 %v1088_v1  ;;  %v1109_v48 = vld [vmem:[#allocation9 + $0xe0] ss:$8 sps:$4 sm:$0xff]  }
  0x89   :  { %780 = vmatprep.subr.bf16.mxu0 %v1093_v2 }
  0x8b   :  { %530 = vmatpush1.bf16.msra.mxu1 %v1066_v49  ;;  %v1114_v49 = vld [vmem:[#allocation9 + $0xf4] ss:$8 sps:$4 sm:$0xff]  }
  0x8c   :  { %781 = vmatpush1.bf16.msra.mxu0 %v1091_v3 }
  0x8d   :  { %782 = vmatprep.subr.bf16.mxu0 %v1096_v4 }
  0x90   :  { %783 = vmatpush1.bf16.msra.mxu0 %v1094_v5 }
  0x91   :  { %784 = vmatprep.subr.bf16.mxu0 %v1099_v39 }
  0x94   :  { %785 = vmatpush1.bf16.msra.mxu0 %v1097_v40 }
  0x95   :  { %786 = vmatprep.subr.bf16.mxu0 %v1102_v41 }
  0x98   :  { %787 = vmatpush1.bf16.msra.mxu0 %v1100_v42 }
  0x99   :  { %788 = vmatprep.subr.bf16.mxu0 %v1105_v43 }
  0x9c   :  { %789 = vmatpush1.bf16.msra.mxu0 %v1103_v44 }
  0x9d   :  { %790 = vmatprep.subr.bf16.mxu0 %v1108_v45 }
  0xa0   :  { %791 = vmatpush1.bf16.msra.mxu0 %v1106_v46 }
  0xa1   :  { %792 = vmatprep.subr.bf16.mxu0 %v1111_v47 }
  0xa4   :  { %793 = vmatpush1.bf16.msra.mxu0 %v1109_v48 }
  0xa5   :  { %794 = vmatprep.subr.bf16.mxu0 %v1114_v49 }
  0xa8   :  { %795 = vmatpush1.bf16.msra.mxu0 %v1112_v50 }
 0x13e   :  { %v237_v13 = vpop.f32.mrb[0].mxu0 }
 0x13f   :  { %v273_v14 = vadd.f32 %v266_v11, %v237_v13  ;;  %v239_v15 = vpop.f32.mrb[1].mxu0 }
 0x140   :  { %v274_v16 = vadd.f32 %v270_v12, %v239_v15  ;;  %v241_v17 = vpop.f32.mrb[2].mxu0 }
 0x141   :  { %v277_v18 = vmul.f32 0.5, %v273_v14  ;;  %v275_v19 = vadd.f32 %v266_v11, %v241_v17  ;;  %v243_v20 = vpop.f32.mrb[3].mxu0 }
 0x142   :  { %v278_v21 = vmul.f32 0.5, %v274_v16  ;;  %v276_v22 = vadd.f32 %v270_v12, %v243_v20  ;;  %v826_v20 = vld [vmem:[%s1435_s8] sm:$0xff] }
 0x143   :  { %1117 = vtanh.f32 %v277_v18  ;;  %v279_v23 = vmul.f32 0.5, %v275_v19  ;;  %v823_v18 = vld [vmem:[%s1434_s7] sm:$0xff]  ;;  %829 = vperm.xlu0 %993, %v826_v20  }
 0x144   :  { %1119 = vtanh.f32 %v278_v21  ;;  %v280_v24 = vmul.f32 0.5, %v276_v22  ;;  %v984_v19 = vcombine.high %v823_v18, %v823_v18  ;;  %v592_v21 = vld [vmem:[%s1433_s6] sm:$0x3]  ;;  %v983_v48 = vcombine.low %v823_v18, %v823_v18  ;;  %s1268_s6 = smov [#allocation11]  }
 0x145   :  { %1121 = vtanh.f32 %v279_v23  ;;  %v597_v22 = vrot.slane %v592_v21, %v1393_v8  ;;  %v601_v23 = vrot.slane %v592_v21, %v1395_v10  ;;  %s891_s7 = sshll.u32 %s1268_s6, 4  ;;  %s892_s7 = int_to_ptr.vmem [resolvable:$true] %s891_s7 }
 0x146   :  { %1123 = vtanh.f32 %v280_v24  ;;  %s1231_s8 = scalar_lea.vmem %s892_s7, 128  ;;  %p1236_p5 = scmp.lt.s32.totalorder %s892_s7, %s892_s7 }
 0x147   :  { %p1232_p4 = scmp.ne.s32.totalorder %s892_s7, %s1231_s8  ;;  %p1237_p6 = scmp.lt.s32.totalorder %s1231_s8, %s1231_s8 }
 0x149   :  { %p1238_p7 = por %p1237_p6, %p1236_p5 }
 0x14b   :  { %p1239_p8 = pnand %p1238_p7, %p1232_p4 }
 0x14d   :  { %v1118_v25 = vpop.eup %1117 }
 0x14e   :  { %v1120_v26 = vpop.eup %1119  ;;  %v285_v27 = vmul.f32 0.5, %v1118_v25 }
 0x14f   :  { %v1122_v28 = vpop.eup %1121  ;;  %v286_v29 = vmul.f32 0.5, %v1120_v26 }
 0x150   :  { %v1124_v30 = vpop.eup %1123  ;;  %v287_v31 = vmul.f32 0.5, %v1122_v28  ;;  %v289_v33 = vadd.f32 0.5, %v285_v27 }
 0x151   :  { %v288_v32 = vmul.f32 0.5, %v1124_v30  ;;  %v290_v35 = vadd.f32 0.5, %v286_v29 }
 0x152   :  { %v291_v34 = vadd.f32 0.5, %v287_v31 }
 0x153   :  { %v292_v36 = vadd.f32 0.5, %v288_v32 }
 0x154   :  { %v293_v37 = vpack.c.bf16 %v291_v34, %v289_v33 }
 0x155   :  { %v294_v38 = vpack.c.bf16 %v292_v36, %v290_v35 }
 0x157   :  { %531 = vmatprep.mubr.bf16.mxu1 %v294_v38 }
 0x158   :  { %532 = vmatmul.mubr.bf16.vlgmr.msra.gmra.mrb[0].mxu1 %v293_v37 }
 0x159   :  { %871 = vmatprep.mubr.bf16.mxu1 %v984_v19 }
 0x1c2   :  { %v830_v49 = vpop.permute.xlu0 %829 }
 0x22b   :  { %v533_v54 = vpop.f32.mrb[0].mxu1 }
 0x22c   :  { %v534_v55 = vadd.f32 %v533_v54, %v332_v52  ;;  %v535_v56 = vpop.f32.mrb[1].mxu1 }
 0x22d   :  { %v536_v57 = vadd.f32 %v535_v56, %v336_v53  ;;  %v537_v58 = vpop.f32.mrb[2].mxu1 }
 0x22e   :  { %v542_v59 = vmul.f32 0.5, %v534_v55  ;;  %v538_v60 = vadd.f32 %v537_v58, %v332_v52  ;;  %v539_v61 = vpop.f32.mrb[3].mxu1 }
 0x22f   :  { %v543_v62 = vmul.f32 0.5, %v536_v57  ;;  %v540_v63 = vadd.f32 %v539_v61, %v336_v53 }
 0x230   :  { %1125 = vtanh.f32 %v542_v59  ;;  %v544_v0 = vmul.f32 0.5, %v538_v60 }
 0x231   :  { %1127 = vtanh.f32 %v543_v62  ;;  %v545_v1 = vmul.f32 0.5, %v540_v63 }
 0x232   :  { %1129 = vtanh.f32 %v544_v0 }
 0x233   :  { %1131 = vtanh.f32 %v545_v1 }
 0x23a   :  { %v1126_v2 = vpop.eup %1125 }
 0x23b   :  { %v1128_v3 = vpop.eup %1127  ;;  %v550_v4 = vmul.f32 0.5, %v1126_v2 }
 0x23c   :  { %v1130_v5 = vpop.eup %1129  ;;  %v551_v6 = vmul.f32 0.5, %v1128_v3 }
 0x23d   :  { %v1132_v7 = vpop.eup %1131  ;;  %v552_v9 = vmul.f32 0.5, %v1130_v5  ;;  %v554_v12 = vadd.f32 0.5, %v550_v4 }
 0x23e   :  { %v553_v11 = vmul.f32 0.5, %v1132_v7  ;;  %v555_v14 = vadd.f32 0.5, %v551_v6 }
 0x23f   :  { %v556_v13 = vadd.f32 0.5, %v552_v9 }
 0x240   :  { %v557_v15 = vadd.f32 0.5, %v553_v11 }
 0x241   :  { %v558_v16 = vpack.c.bf16 %v556_v13, %v554_v12 }
 0x242   :  { %v559_v17 = vpack.c.bf16 %v557_v15, %v555_v14 }
 0x244   :  { %796 = vmatprep.mubr.bf16.mxu0 %v559_v17 }
 0x245   :  { %797 = vmatmul.mubr.bf16.vlgmr.msra.gmra.mrb[4].mxu0 %v558_v16 }
 0x318   :  { %v798_v24 = vpop.f32.mrb[4].mxu0 }
 0x319   :  { %v799_v25 = vadd.f32 %v798_v24, %v597_v22  ;;  %v800_v26 = vpop.f32.mrb[5].mxu0 }
 0x31a   :  { %v801_v27 = vadd.f32 %v800_v26, %v601_v23  ;;  %v802_v28 = vpop.f32.mrb[6].mxu0 }
 0x31b   :  { %v807_v29 = vmul.f32 0.5, %v799_v25  ;;  %v803_v30 = vadd.f32 %v802_v28, %v597_v22  ;;  %v804_v31 = vpop.f32.mrb[7].mxu0 }
 0x31c   :  { %v808_v32 = vmul.f32 0.5, %v801_v27  ;;  %v805_v33 = vadd.f32 %v804_v31, %v601_v23 }
 0x31d   :  { %1133 = vtanh.f32 %v807_v29  ;;  %v809_v34 = vmul.f32 0.5, %v803_v30 }
 0x31e   :  { %1135 = vtanh.f32 %v808_v32  ;;  %v810_v35 = vmul.f32 0.5, %v805_v33 }
 0x31f   :  { %1137 = vtanh.f32 %v809_v34 }
 0x320   :  { %1139 = vtanh.f32 %v810_v35 }
 0x327   :  { %v1134_v36 = vpop.eup %1133 }
 0x328   :  { %v1136_v8 = vpop.eup %1135  ;;  %v815_v37 = vmul.f32 0.5, %v1134_v36 }
 0x329   :  { %v1138_v10 = vpop.eup %1137  ;;  %v816_v38 = vmul.f32 0.5, %v1136_v8 }
 0x32a   :  { %v1140_v39 = vpop.eup %1139  ;;  %v817_v40 = vmul.f32 0.5, %v1138_v10  ;;  %v819_v42 = vadd.f32 0.5, %v815_v37 }
 0x32b   :  { %v818_v41 = vmul.f32 0.5, %v1140_v39  ;;  %v820_v44 = vadd.f32 0.5, %v816_v38 }
 0x32c   :  { %v821_v43 = vadd.f32 0.5, %v817_v40 }
 0x32d   :  { %v822_v45 = vadd.f32 0.5, %v818_v41 }
 0x32e   :  { %v824_v46 = vpack.c.bf16 %v821_v43, %v819_v42 }
 0x32f   :  { %v825_v47 = vpack.c.bf16 %v822_v45, %v820_v44 }
 0x331   :  { %839 = vmatprep.subr.bf16.mxu1 %v825_v47 }
 0x332   :  { %840 = vmatpush1.bf16.xpose.msra.mxu1 %v824_v46 }
 0x339   :  { %872 = vmatmul.mubr.bf16.vlgmr.msra.gmra.mrb[4].mxu1 %v983_v48 }
 0x40c   :  { %v873_v50 = vpop.f32.mrb[4].mxu1 }
 0x40d   :  { %v874_v51 = vadd.f32 %v873_v50, %v830_v49  ;;  %v875_v52 = vpop.f32.mrb[5].mxu1 }
 0x40e   :  { %v876_v53 = vpop.f32.mrb[6].mxu1 }
 0x40f   :  { %v879_v54 = vmul.f32 0.5, %v874_v51  ;;  %v877_v55 = vpop.f32.mrb[7].mxu1 }
 0x411   :  { %1141 = vtanh.f32 %v879_v54 }
 0x41b   :  { %v1142_v56 = vpop.eup %1141 }
 0x41c   :  { %v881_v57 = vmul.f32 0.5, %v1142_v56 }
 0x41e   :  { %v882_v58 = vadd.f32 0.5, %v881_v57 }
 0x420   :  { %884 = vst.msk [vmem:[#allocation11] sm:$0xff] %vm883_vm0, %v882_v58 }
 0x421   :  { %1242 = shalt.err (!%p1239_p8)
}
 0x422   :  { %s1243_s23 = scalar_lea.hbm %s1436_s9, 128 }
 0x423   :  { %p1244_p9 = scmp.ne.s32.totalorder %s1436_s9, %s1243_s23  ;;  %p1247_p10 = scmp.lt.u32.totalorder %s1243_s23, %s1436_s9 }
 0x425   :  { %p1249_p11 = pnand %p1247_p10, %p1244_p9 }
 0x427   :  { %1252 = shalt.err (!%p1249_p11)
}
 0x428   :  { %894 = dma.vmem_to_hbm [thread:$0]  %s892_s7, 128, %s1436_s9, [#allocation5]  }
 0x429   :  { %1259 = dma.done.wait [#allocation5], 128  }
 0x42a   :  { %1260 = vsyncadd [#allocation5], 4294967168 }
 0x42b   :  { %898 = vsyncpa [#allocation4], 1 }
 0x42c   :  { %899 = vsyncpa [#allocation7], 1 }
 0x42d   :  { %900 = vsyncpa [#allocation10], 1 }
 0x42e   :  { %901 = vsyncpa [#allocation5], 1 }

</bundles_post_ra>
